<compile_context>
chip_gen: v7x
topology: tpu7x:2x2x1
jax: 0.10.0
libtpu: 0.0.40
codegen_flags: <defaults>
</compile_context>

<pallas_src>
import functools

import jax
import jax.numpy as jnp
from jax import lax
from jax.experimental import pallas as pl
from jax.experimental.pallas import tpu as pltpu

LANE = 128


def _round_up(x, m):
    return (x + m - 1) // m * m


def _device_config():
    """Return (num_tensorcores, max_block_rows) for the local TPU."""
    num_cores, max_rows = 1, 4096
    try:
        dev = jax.devices()[0]
        if dev.platform == "tpu":
            kind = dev.device_kind.lower().replace(" ", "")
            if "v7" in kind:
                num_cores, max_rows = 2, 8192          # 2 TCs, 64 MiB VMEM
            elif "v6" in kind:
                num_cores, max_rows = 1, 8192          # 1 TC, 128 MiB VMEM
            elif "lite" in kind or "v5e" in kind:
                num_cores, max_rows = 1, 4096          # v5e: 16 MiB scoped default
            elif "v5p" in kind or "v5" in kind or "v4" in kind:
                num_cores, max_rows = 2, 8192          # megacore: 2 TCs / device
    except Exception:
        pass
    return num_cores, max_rows


def _vmem_limit(block_rows, dtypes):
    """Explicit VMEM budget: double-buffered tiles + headroom, >= default."""
    tile_bytes = sum(block_rows * LANE * jnp.dtype(d).itemsize for d in dtypes)
    need = 2 * tile_bytes + (2 << 20)
    return int(min(max(need, 32 << 20), 64 << 20))


def _focal_elementwise(x, t, alpha, gamma, logits, binary_targets=False):
    """Per-element focal loss, matching torch semantics (computed in f32)."""
    x = x.astype(jnp.float32)
    t = t.astype(jnp.float32)
    if logits:
        # F.binary_cross_entropy_with_logits (numerically stable form)
        bce = jnp.maximum(x, 0.0) - x * t + jnp.log1p(jnp.exp(-jnp.abs(x)))
        pt = jnp.exp(-bce)
    elif binary_targets:
        # Opt-in fast path: targets guaranteed in {0, 1} -> 1 log, no exp.
        pt = jnp.where(t > 0.5, x, 1.0 - x)
        bce = -jnp.maximum(jnp.log(pt), -100.0)
    else:
        # F.binary_cross_entropy clamps each log term at -100
        bce = -(t * jnp.maximum(jnp.log(x), -100.0)
                + (1.0 - t) * jnp.maximum(jnp.log(1.0 - x), -100.0))
        pt = jnp.exp(-bce)
    one_m_pt = 1.0 - pt
    g = float(gamma)
    if g.is_integer():
        # integer_pow -> pure multiplies (no EUP transcendentals)
        mod = one_m_pt ** int(g)
    else:
        # clamp base so pt == 1 does not produce log(0) issues
        mod = jnp.exp(g * jnp.log(jnp.maximum(one_m_pt, 1e-30)))
    return alpha * mod * bce


def _focal_sum_kernel(x_ref, t_ref, out_ref, *, alpha, gamma, logits,
                      binary_targets, nblocks, blocks_per_core, block_rows,
                      tail_rows):
    c = pl.program_id(0)   # TensorCore split (parallel)
    i = pl.program_id(1)   # reduction steps per core (arbitrary)
    blk = c * blocks_per_core + i

    @pl.when(i == 0)
    def _():
        out_ref[...] = jnp.zeros_like(out_ref)

    def partial_sum():
        fl = _focal_elementwise(x_ref[...], t_ref[...], alpha, gamma, logits,
                                binary_targets)
        # Fold (block_rows, 128) onto the (8, 128) accumulator: leading-dim
        # sum = plain VPU adds, no per-step cross-lane reduce.
        return jnp.sum(fl.reshape(block_rows // 8, 8, LANE), axis=0)

    if tail_rows == 0:
        # Every real block is full: completely mask-free hot loop.  Clamped /
        # over-provisioned blocks (blk >= nblocks) are skipped entirely.
        @pl.when(blk < nblocks)
        def _():
            out_ref[...] += partial_sum()
    else:
        # Interior blocks: mask-free.
        @pl.when(blk < nblocks - 1)
        def _():
            out_ref[...] += partial_sum()

        # Last block only: rows past `tail_rows` are stale VMEM garbage
        # (boundary block); zero them with a select (NaN-safe).
        @pl.when(blk == nblocks - 1)
        def _():
            fl = _focal_elementwise(x_ref[...], t_ref[...], alpha, gamma,
                                    logits, binary_targets)
            row = lax.broadcasted_iota(jnp.int32, (block_rows, LANE), 0)
            fl = jnp.where(row < tail_rows, fl, 0.0)
            out_ref[...] += jnp.sum(fl.reshape(block_rows // 8, 8, LANE),
                                    axis=0)


def _focal_map_kernel(x_ref, t_ref, o_ref, *, alpha, gamma, logits,
                      binary_targets):
    o_ref[...] = _focal_elementwise(x_ref[...], t_ref[...], alpha, gamma,
                                    logits, binary_targets).astype(o_ref.dtype)


def focal_loss(inputs, targets, alpha=1.0, gamma=2, logits=False, reduce=True,
               binary_targets=False):
    orig_shape = inputs.shape
    x = inputs.reshape(-1)     # free (bitcast); keep native dtype
    t = targets.reshape(-1)
    n = x.shape[0]

    # Lane padding only when n % 128 != 0, and with LOSS-NEUTRAL values so the
    # padded elements contribute exactly 0 to the sum (no in-kernel element
    # mask needed).  Not hit for lane-aligned inputs (e.g. the demo shapes).
    pad = _round_up(n, LANE) - n
    if pad:
        if logits:
            x = jnp.pad(x, (0, pad), constant_values=100.0)  # sigmoid(x) -> 1
        else:
            x = jnp.pad(x, (0, pad), constant_values=1.0)
        t = jnp.pad(t, (0, pad), constant_values=1.0)
    rows = (n + pad) // LANE

    num_cores, max_rows = _device_config()

    # Sublane multiple depends on dtype packing (8 f32, 16 bf16, 32 int8/fp8).
    def _packing(dt):
        return max(1, 4 // jnp.dtype(dt).itemsize)
    sub = 8 * max(_packing(x.dtype), _packing(t.dtype))
    block_rows = min(max_rows, _round_up(rows, sub))

    x2 = x.reshape(rows, LANE)
    t2 = t.reshape(rows, LANE)
    nblocks = pl.cdiv(rows, block_rows)
    tail_rows = rows % block_rows   # 0 => blocks tile the rows exactly

    if reduce:
        blocks_per_core = pl.cdiv(nblocks, num_cores)

        def row_block(c, i):
            # Clamp so over-provisioned grid steps never index past the last
            # block; their compute/accumulation is skipped in the kernel.
            return (jnp.minimum(c * blocks_per_core + i, nblocks - 1), 0)

        kernel = functools.partial(
            _focal_sum_kernel,
            alpha=float(alpha), gamma=gamma, logits=bool(logits),
            binary_targets=bool(binary_targets),
            nblocks=nblocks, blocks_per_core=blocks_per_core,
            block_rows=block_rows, tail_rows=tail_rows)

        partials = pl.pallas_call(
            kernel,
            out_shape=jax.ShapeDtypeStruct((num_cores * 8, LANE), jnp.float32),
            grid_spec=pltpu.PrefetchScalarGridSpec(
                num_scalar_prefetch=0,
                grid=(num_cores, blocks_per_core),
                in_specs=[pl.BlockSpec((block_rows, LANE), row_block),
                          pl.BlockSpec((block_rows, LANE), row_block)],
                out_specs=pl.BlockSpec((8, LANE), lambda c, i: (c, 0)),
            ),
            compiler_params=pltpu.CompilerParams(
                dimension_semantics=("parallel", "arbitrary"),
                vmem_limit_bytes=_vmem_limit(block_rows,
                                             [x2.dtype, t2.dtype])),
        )(x2, t2)
        # Tiny final reduction of the per-core (8, 128) partials.
        return jnp.sum(partials) / n
    else:
        kernel = functools.partial(
            _focal_map_kernel, alpha=float(alpha), gamma=gamma,
            logits=bool(logits), binary_targets=bool(binary_targets))
        out = pl.pallas_call(
            kernel,
            out_shape=jax.ShapeDtypeStruct((rows, LANE), inputs.dtype),
            grid_spec=pltpu.PrefetchScalarGridSpec(
                num_scalar_prefetch=0,
                grid=(nblocks,),
                in_specs=[pl.BlockSpec((block_rows, LANE), lambda i: (i, 0)),
                          pl.BlockSpec((block_rows, LANE), lambda i: (i, 0))],
                out_specs=pl.BlockSpec((block_rows, LANE), lambda i: (i, 0)),
            ),
            compiler_params=pltpu.CompilerParams(
                dimension_semantics=("parallel",),
                vmem_limit_bytes=_vmem_limit(
                    block_rows, [x2.dtype, t2.dtype, inputs.dtype])),
        )(x2, t2)
        if pad:
            # TODO(synk): a fully copy-free ragged map path would need a
            # masked store on the last block; here padded outputs (all 0)
            # are trimmed, which only costs a copy when n % 128 != 0.
            return out.reshape(-1)[:n].reshape(orig_shape)
        return out.reshape(orig_shape)


def _focal_loss_ref(inputs, targets, alpha=1.0, gamma=2, logits=False,
                    reduce=True):
    fl = _focal_elementwise(inputs, targets, alpha, gamma, logits)
    return jnp.mean(fl) if reduce else fl


if __name__ == "__main__":
    key = jax.random.PRNGKey(0)
    kx, kt = jax.random.split(key)

    shape = (2, 4, 16, 16)
    logits_in = jax.random.normal(kx, shape, dtype=jnp.float32)
    probs_in = jax.nn.sigmoid(logits_in)             # (0, 1) for logits=False
    targets = jax.random.bernoulli(kt, 0.5, shape).astype(jnp.float32)

    # Default module config: alpha=1, gamma=2, logits=False, reduce=True.
    out = focal_loss(probs_in, targets, alpha=1.0, gamma=2, logits=False,
                     reduce=True)
    out = jax.block_until_ready(out)
    ref = _focal_loss_ref(probs_in, targets, alpha=1.0, gamma=2, logits=False,
                          reduce=True)
    assert jnp.allclose(out, ref, rtol=1e-5, atol=1e-6), (out, ref)

    # logits=True path (reduce=True).
    out_l = focal_loss(logits_in, targets, alpha=1.0, gamma=2, logits=True,
                       reduce=True)
    out_l = jax.block_until_ready(out_l)
    ref_l = _focal_loss_ref(logits_in, targets, alpha=1.0, gamma=2,
                            logits=True, reduce=True)
    assert jnp.allclose(out_l, ref_l, rtol=1e-5, atol=1e-6), (out_l, ref_l)

    # reduce=False path (elementwise map).
    out_map = focal_loss(probs_in, targets, reduce=False)
    out_map = jax.block_until_ready(out_map)
    ref_map = _focal_loss_ref(probs_in, targets, reduce=False)
    assert out_map.shape == shape
    assert jnp.allclose(out_map, ref_map, rtol=1e-5, atol=1e-6)

    # Opt-in binary-target fast path (targets are {0,1} here).
    out_b = focal_loss(probs_in, targets, reduce=True, binary_targets=True)
    out_b = jax.block_until_ready(out_b)
    assert jnp.allclose(out_b, ref, rtol=1e-5, atol=1e-6), (out_b, ref)

    print("KERNEL_OK")
</pallas_src>

<mosaic_0001>
module attributes {stable_mosaic.version = 11 : i64} {
  func.func @_focal_sum_kernel(%arg0: i32, %arg1: i32, %arg2: memref<16x128xf32, #tpu.memory_space<vmem>>, %arg3: memref<16x128xf32, #tpu.memory_space<vmem>>, %arg4: memref<8x128xf32, #tpu.memory_space<vmem>>) attributes {dimension_semantics = [#tpu.dimension_semantics<parallel>, #tpu.dimension_semantics<arbitrary>], iteration_bounds = array<i64: 1, 1>, scalar_prefetch = 0 : i64, scratch_operands = 0 : i64, tpu.core_type = #tpu.core_type<tc>, window_params = [{transform_indices = @transform_0, window_bounds = array<i64: 16, 128>}, {transform_indices = @transform_1, window_bounds = array<i64: 16, 128>}, {transform_indices = @transform_2, window_bounds = array<i64: 8, 128>}]} {
    %c1_i32 = arith.constant 1 : i32
    %0 = arith.muli %arg0, %c1_i32 : i32
    %1 = arith.addi %0, %arg1 : i32
    %c0_i32 = arith.constant 0 : i32
    %2 = arith.cmpi eq, %arg1, %c0_i32 : i32
    %3 = arith.extui %2 : i1 to i32
    %c0_i32_0 = arith.constant 0 : i32
    %4 = arith.cmpi ne, %3, %c0_i32_0 : i32
    scf.if %4 {
      %cst = arith.constant 0.000000e+00 : f32
      %8 = vector.broadcast %cst : f32 to vector<8x128xf32>
      %c0 = arith.constant 0 : index
      %c0_3 = arith.constant 0 : index
      %9 = vector.load %arg4[%c0, %c0_3] : memref<8x128xf32, #tpu.memory_space<vmem>>, vector<8x128xf32>
      tpu.vector_store %arg4[%c0, %c0_3], %8 {strides = array<i32>} : memref<8x128xf32, #tpu.memory_space<vmem>>, vector<8x128xf32>,
    } else {
    }
    %c1_i32_1 = arith.constant 1 : i32
    %5 = arith.cmpi slt, %1, %c1_i32_1 : i32
    %6 = arith.extui %5 : i1 to i32
    %c0_i32_2 = arith.constant 0 : i32
    %7 = arith.cmpi ne, %6, %c0_i32_2 : i32
    scf.if %7 {
      %c0 = arith.constant 0 : index
      %c0_3 = arith.constant 0 : index
      %8 = vector.load %arg4[%c0, %c0_3] : memref<8x128xf32, #tpu.memory_space<vmem>>, vector<8x128xf32>
      %c0_4 = arith.constant 0 : index
      %c0_5 = arith.constant 0 : index
      %9 = vector.load %arg2[%c0_4, %c0_5] : memref<16x128xf32, #tpu.memory_space<vmem>>, vector<16x128xf32>
      %c0_6 = arith.constant 0 : index
      %c0_7 = arith.constant 0 : index
      %10 = vector.load %arg3[%c0_6, %c0_7] : memref<16x128xf32, #tpu.memory_space<vmem>>, vector<16x128xf32>
      %11 = math.log %9 : vector<16x128xf32>
      %cst = arith.constant -1.000000e+02 : f32
      %12 = vector.broadcast %cst : f32 to vector<16x128xf32>
      %13 = arith.maximumf %11, %12 : vector<16x128xf32>
      %14 = arith.mulf %10, %13 : vector<16x128xf32>
      %cst_8 = arith.constant 1.000000e+00 : f32
      %15 = vector.broadcast %cst_8 : f32 to vector<16x128xf32>
      %16 = arith.subf %15, %10 : vector<16x128xf32>
      %cst_9 = arith.constant 1.000000e+00 : f32
      %17 = vector.broadcast %cst_9 : f32 to vector<16x128xf32>
      %18 = arith.subf %17, %9 : vector<16x128xf32>
      %19 = math.log %18 : vector<16x128xf32>
      %cst_10 = arith.constant -1.000000e+02 : f32
      %20 = vector.broadcast %cst_10 : f32 to vector<16x128xf32>
      %21 = arith.maximumf %19, %20 : vector<16x128xf32>
      %22 = arith.mulf %16, %21 : vector<16x128xf32>
      %23 = arith.addf %14, %22 : vector<16x128xf32>
      %cst_11 = arith.constant 0.000000e+00 : f32
      %24 = vector.broadcast %cst_11 : f32 to vector<16x128xf32>
      %25 = arith.subf %24, %23 : vector<16x128xf32>
      %cst_12 = arith.constant 0.000000e+00 : f32
      %26 = vector.broadcast %cst_12 : f32 to vector<16x128xf32>
      %27 = arith.subf %26, %25 : vector<16x128xf32>
      %28 = math.exp %27 : vector<16x128xf32>
      %cst_13 = arith.constant 1.000000e+00 : f32
      %29 = vector.broadcast %cst_13 : f32 to vector<16x128xf32>
      %30 = arith.subf %29, %28 : vector<16x128xf32>
      %31 = arith.mulf %30, %30 : vector<16x128xf32>
      %cst_14 = arith.constant 1.000000e+00 : f32
      %32 = vector.broadcast %cst_14 : f32 to vector<16x128xf32>
      %33 = arith.mulf %32, %31 : vector<16x128xf32>
      %34 = arith.mulf %33, %25 : vector<16x128xf32>
      %35 = vector.shape_cast %34 : vector<16x128xf32> to vector<2x8x128xf32>
      %cst_15 = arith.constant dense<0.000000e+00> : vector<8x128xf32>
      %36 = vector.multi_reduction <add>, %35, %cst_15 [0] : vector<2x8x128xf32> to vector<8x128xf32>
      %37 = arith.addf %8, %36 : vector<8x128xf32>
      %c0_16 = arith.constant 0 : index
      %c0_17 = arith.constant 0 : index
      %38 = vector.load %arg4[%c0_16, %c0_17] : memref<8x128xf32, #tpu.memory_space<vmem>>, vector<8x128xf32>
      tpu.vector_store %arg4[%c0_16, %c0_17], %37 {strides = array<i32>} : memref<8x128xf32, #tpu.memory_space<vmem>>, vector<8x128xf32>,
    } else {
    }
    return
  }
  func.func @transform_0(%arg0: i32, %arg1: i32) -> (i32, i32) {
    %c1_i32 = arith.constant 1 : i32
    %0 = arith.muli %arg0, %c1_i32 : i32
    %1 = arith.addi %0, %arg1 : i32
    %c0_i32 = arith.constant 0 : i32
    %2 = arith.minsi %1, %c0_i32 : i32
    %c0_i32_0 = arith.constant 0 : i32
    %c0_i32_1 = arith.constant 0 : i32
    return %2, %c0_i32_0 : i32, i32
  }
  func.func @transform_1(%arg0: i32, %arg1: i32) -> (i32, i32) {
    %c1_i32 = arith.constant 1 : i32
    %0 = arith.muli %arg0, %c1_i32 : i32
    %1 = arith.addi %0, %arg1 : i32
    %c0_i32 = arith.constant 0 : i32
    %2 = arith.minsi %1, %c0_i32 : i32
    %c0_i32_0 = arith.constant 0 : i32
    %c0_i32_1 = arith.constant 0 : i32
    return %2, %c0_i32_0 : i32, i32
  }
  func.func @transform_2(%arg0: i32, %arg1: i32) -> (i32, i32) {
    %c0_i32 = arith.constant 0 : i32
    %c0_i32_0 = arith.constant 0 : i32
    return %arg0, %c0_i32 : i32, i32
  }
}

</mosaic_0001>

<bundles_post_ra>
// kernel: tpu_custom_call.1
= control target key start
LH: loop header
LB: loop body
LE: loop exit
PB: predicated region body
PF: predicated region fallthrough
CT: control target
= control target key end

     0   :  { %7 = vsyncpa [#allocation3], 0  ;;  %s280_s0 = inlined_call_operand.hbm [shape: f32[16,128], index: 0, kind: input, shape index: {}]   ;;  %s281_s1 = inlined_call_operand.hbm [shape: f32[16,128], index: 1, kind: input, shape index: {}]   ;;  %s282_s2 = inlined_call_operand.hbm [shape: f32[8,128], index: 2, kind: output, shape index: {}]  }
   0x1   :  { %8 = vsyncpa [#allocation6], 0 }
   0x2   :  { %9 = vsyncpa [#allocation4], 0  ;;  %s224_s9 = smov [#allocation2]   ;;  %s152_s13 = scalar_lea.hbm %s280_s0, 256 }
   0x3   :  { %s21_s10 = sshll.u32 %s224_s9, 4  ;;  %p153_p0 = scmp.ne.s32.totalorder %s280_s0, %s152_s13  ;;  %s22_s10 = int_to_ptr.vmem [resolvable:$true] %s21_s10 }
   0x4   :  { %p156_p1 = scmp.lt.u32.totalorder %s152_s13, %s280_s0 }
   0x6   :  { %p158_p2 = pnand %p156_p1, %p153_p0 }
   0x8   :  { %161 = shalt.err (!%p158_p2)
}
   0x9   :  { %s162_s18 = scalar_lea.vmem %s22_s10, 256  ;;  %p167_p4 = scmp.lt.s32.totalorder %s22_s10, %s22_s10 }
   0xa   :  { %p163_p3 = scmp.ne.s32.totalorder %s22_s10, %s162_s18  ;;  %p168_p5 = scmp.lt.s32.totalorder %s162_s18, %s162_s18 }
   0xc   :  { %p169_p6 = por %p168_p5, %p167_p4 }
   0xe   :  { %p170_p7 = pnand %p169_p6, %p163_p3 }
  0x10   :  { %173 = shalt.err (!%p170_p7)
}
  0x11   :  { %s225_s19 = smov 128   ;;  %s226_s20 = smov 8  }
  0x12   :  { %27 = dma.hbm_to_vmem [thread:$0]  %s280_s0, 256, %s22_s10, [#allocation3], %s225_s19, %s225_s19, %s226_s20  }
  0x13   :  { %s227_s23 = smov [#allocation5]   ;;  %s174_s27 = scalar_lea.hbm %s281_s1, 256 }
  0x14   :  { %s39_s24 = sshll.u32 %s227_s23, 4  ;;  %p175_p8 = scmp.ne.s32.totalorder %s281_s1, %s174_s27  ;;  %s40_s24 = int_to_ptr.vmem [resolvable:$true] %s39_s24 }
  0x15   :  { %p178_p9 = scmp.lt.u32.totalorder %s174_s27, %s281_s1 }
  0x17   :  { %p180_p10 = pnand %p178_p9, %p175_p8 }
  0x19   :  { %183 = shalt.err (!%p180_p10)
}
  0x1a   :  { %s184_s4 = scalar_lea.vmem %s40_s24, 256  ;;  %p189_p12 = scmp.lt.s32.totalorder %s40_s24, %s40_s24 }
  0x1b   :  { %p185_p11 = scmp.ne.s32.totalorder %s40_s24, %s184_s4  ;;  %p190_p13 = scmp.lt.s32.totalorder %s184_s4, %s184_s4 }
  0x1d   :  { %p191_p0 = por %p190_p13, %p189_p12 }
  0x1f   :  { %p192_p1 = pnand %p191_p0, %p185_p11 }
  0x21   :  { %195 = shalt.err (!%p192_p1)
}
  0x22   :  { %45 = dma.hbm_to_vmem [thread:$0]  %s281_s1, 256, %s40_s24, [#allocation6], %s225_s19, %s225_s19, %s226_s20  }
  0x23   :  { %218 = dma.done.wait [#allocation3], 256  }
  0x24   :  { %219 = vsyncadd [#allocation3], 4294967040 }
  0x25   :  { %220 = dma.done.wait [#allocation6], 256  }
  0x26   :  { %221 = vsyncadd [#allocation6], 4294967040  ;;  %v71_v0 = vld [vmem:[#allocation2] sm:$0xff]  ;;  %v72_v1 = vld [vmem:[#allocation2 + $0x8] sm:$0xff]  ;;  %s228_s1 = smov [#allocation7]  }
  0x27   :  { %140 = vlog2.f32 %v71_v0  ;;  %v85_v2 = vsub.f32 1.0, %v71_v0  ;;  %v86_v3 = vsub.f32 1.0, %v72_v1  ;;  %v73_v5 = vld [vmem:[#allocation5] sm:$0xff]  ;;  %v74_v7 = vld [vmem:[#allocation5 + $0x8] sm:$0xff]  ;;  %s120_s6 = sshll.u32 %s228_s1, 4  ;;  %s121_s6 = int_to_ptr.vmem [resolvable:$true] %s120_s6 }
  0x28   :  { %142 = vlog2.f32 %v72_v1  ;;  %v83_v13 = vsub.f32 1.0, %v73_v5  ;;  %v84_v16 = vsub.f32 1.0, %v74_v7  ;;  %s196_s7 = scalar_lea.vmem %s121_s6, 128  ;;  %p201_p3 = scmp.lt.s32.totalorder %s121_s6, %s121_s6 }
  0x29   :  { %144 = vlog2.f32 %v85_v2  ;;  %p197_p2 = scmp.ne.s32.totalorder %s121_s6, %s196_s7  ;;  %p202_p4 = scmp.lt.s32.totalorder %s196_s7, %s196_s7 }
  0x2a   :  { %146 = vlog2.f32 %v86_v3 }
  0x2b   :  { %p203_p5 = por %p202_p4, %p201_p3 }
  0x2d   :  { %p204_p6 = pnand %p203_p5, %p197_p2 }
  0x31   :  { %v141_v4 = vpop.eup %140 }
  0x32   :  { %v143_v6 = vpop.eup %142  ;;  %v76_v8 = vmul.f32 0.6931472, %v141_v4 }
  0x33   :  { %v145_v9 = vpop.eup %144  ;;  %v78_v10 = vmul.f32 0.6931472, %v143_v6 }
  0x34   :  { %v147_v11 = vpop.eup %146  ;;  %v79_v12 = vmax.f32 %v76_v8, -100.0  ;;  %v88_v14 = vmul.f32 0.6931472, %v145_v9 }
  0x35   :  { %v80_v15 = vmax.f32 %v78_v10, -100.0  ;;  %v90_v17 = vmul.f32 0.6931472, %v147_v11 }
  0x36   :  { %v81_v18 = vmul.f32 %v79_v12, %v73_v5  ;;  %v91_v19 = vmax.f32 %v88_v14, -100.0 }
  0x37   :  { %v82_v20 = vmul.f32 %v80_v15, %v74_v7  ;;  %v92_v21 = vmax.f32 %v90_v17, -100.0 }
  0x38   :  { %v93_v22 = vmul.f32 %v91_v19, %v83_v13 }
  0x39   :  { %v94_v23 = vmul.f32 %v92_v21, %v84_v16 }
  0x3a   :  { %v95_v24 = vadd.f32 %v93_v22, %v81_v18 }
  0x3b   :  { %v96_v25 = vadd.f32 %v94_v23, %v82_v20 }
  0x3c   :  { %v97_v26 = vsub.f32 0.0, %v95_v24 }
  0x3d   :  { %v98_v27 = vsub.f32 0.0, %v96_v25 }
  0x3e   :  { %v99_v28 = vsub.f32 0.0, %v97_v26 }
  0x3f   :  { %v100_v29 = vsub.f32 0.0, %v98_v27 }
  0x40   :  { %v101_v30 = vmul.f32 1.442695, %v99_v28 }
  0x41   :  { %v103_v31 = vmul.f32 1.442695, %v100_v29 }
  0x42   :  { %148 = vpow2.f32 %v101_v30 }
  0x43   :  { %150 = vpow2.f32 %v103_v31 }
  0x4c   :  { %v149_v32 = vpop.eup %148 }
  0x4d   :  { %v151_v33 = vpop.eup %150  ;;  %v105_v34 = vsub.f32 1.0, %v149_v32 }
  0x4e   :  { %v106_v35 = vsub.f32 1.0, %v151_v33 }
  0x4f   :  { %v107_v36 = vmul.f32 %v105_v34, %v105_v34 }
  0x50   :  { %v108_v37 = vmul.f32 %v106_v35, %v106_v35 }
  0x51   :  { %v109_v38 = vmul.f32 %v107_v36, %v97_v26 }
  0x52   :  { %v110_v39 = vmul.f32 %v108_v37, %v98_v27 }
  0x54   :  { %v111_v40 = vadd.f32 %v110_v39, %v109_v38 }
  0x56   :  { %113 = vst [vmem:[#allocation7] sm:$0xff] %v111_v40 }
  0x57   :  { %207 = shalt.err (!%p204_p6)
}
  0x58   :  { %s208_s10 = scalar_lea.hbm %s282_s2, 128 }
  0x59   :  { %p209_p7 = scmp.ne.s32.totalorder %s282_s2, %s208_s10  ;;  %p212_p8 = scmp.lt.u32.totalorder %s208_s10, %s282_s2 }
  0x5b   :  { %p214_p9 = pnand %p212_p8, %p209_p7 }
  0x5d   :  { %217 = shalt.err (!%p214_p9)
}
  0x5e   :  { %123 = dma.vmem_to_hbm [thread:$0]  %s121_s6, 128, %s282_s2, [#allocation4]  }
  0x5f   :  { %222 = dma.done.wait [#allocation4], 128  }
  0x60   :  { %223 = vsyncadd [#allocation4], 4294967168 }
  0x61   :  { %127 = vsyncpa [#allocation3], 1 }
  0x62   :  { %128 = vsyncpa [#allocation6], 1 }
  0x63   :  { %129 = vsyncpa [#allocation4], 1 }

</bundles_post_ra>
